<compile_context>
chip_gen: v5e
topology: v5e:2x2
jax: 0.10.0
libtpu: 0.0.40
codegen_flags: <defaults>
</compile_context>

<pallas_src>
import functools
import math

import jax
import jax.numpy as jnp
from jax.experimental import pallas as pl
from jax.experimental.pallas import tpu as pltpu

_LANE = 128


def _residual_fused_kernel(x_ref, o_ref, *, fn):
    """o = fn(x) + x, fn evaluated per-tile in VMEM."""
    x = x_ref[...]
    o_ref[...] = (fn(x) + x).astype(o_ref.dtype)


def _residual_add_kernel(y_ref, x_ref, o_ref):
    """o = y + x  (y = precomputed fn(x))."""
    o_ref[...] = (y_ref[...] + x_ref[...]).astype(o_ref.dtype)


def _chip_budget():
    """Return (target_block_bytes, total_buffer_budget_bytes) for this chip."""
    kind = ""
    try:
        kind = jax.devices()[0].device_kind.lower()
    except Exception:
        pass
    try:
        vmem_phys = int(pltpu.get_tpu_info().vmem_capacity_bytes)
    except Exception:
        vmem_phys = 64 << 20  # assume v7x-sized VMEM if the query fails

    if ("v5 lite" in kind) or ("v5e" in kind) or ("v5litepod" in kind):
        # v5e: 16 MiB scoped-VMEM default -> keep total footprint <= ~12 MiB.
        return 2 << 20, 12 << 20
    # v6e / v7x / unknown: bigger blocks amortize the ~0.35us/step overhead
    # (critical on v7x's 3.2 TB/s HBM); cap total footprint at half physical
    # VMEM (32 MiB on v7x's 64 MiB/TC).
    return 4 << 20, min(vmem_phys // 2, 32 << 20)


def _lane_dense_layout(total, itemsize, target_block_bytes):
    """Choose (cols, rows, block_rows) for a lane-dense 2-D slab."""
    cols = _LANE
    for c in (4096, 2048, 1024, 512, 256, 128):
        if total % c == 0:
            cols = c
            break
    rows = total // cols
    sub = max(32 // itemsize, 8)  # real sublane multiple: 8 f32, 16 bf16, 32 int8

    block_rows = max(target_block_bytes // (cols * itemsize), 1)
    if block_rows >= rows:
        # Small/medium slab: still emit >=2 grid blocks when a sublane-aligned
        # split exists so both v7x TensorCores get a share of the HBM stream.
        if rows >= 2 * sub:
            block_rows = pl.cdiv(rows, 2)
        else:
            return cols, rows, rows  # single full-extent block (no alignment needed)

    block_rows = min(max((block_rows // sub) * sub, sub), rows)
    if rows % block_rows != 0:
        # Prefer a divisor of rows (within 2x) so the last block stays unmasked.
        for br in range(block_rows, max(block_rows // 2, sub) - 1, -sub):
            if rows % br == 0:
                block_rows = br
                break
    return cols, rows, block_rows


def residual(x, fn=None, fn_out=None, donate_x=False):
    """Residual: fn(x) + x.

    Provide exactly one of:
      fn     : elementwise (shape-preserving) jnp-traceable function, fused
               into the kernel.  It is evaluated on flattened tiles, so any
               fn with shape/axis semantics (softmax, norm, conv, ...) must
               go through `fn_out` instead.
      fn_out : precomputed fn(x) (same shape as x); only the `+ x` is fused.
               # TODO(synk): for best perf, fuse the `+ x` directly into the
               # producer kernel of fn_out instead of this standalone pass.
      donate_x : alias x's buffer to the output on the fused path (only valid
               if the caller no longer needs x).
    """
    if (fn is None) == (fn_out is None):
        raise ValueError("provide exactly one of fn / fn_out")
    if fn_out is not None and fn_out.shape != x.shape:
        raise ValueError("fn_out must have the same shape as x")

    orig_shape = x.shape
    total = x.size
    if x.ndim == 0 or total == 0:
        return (fn(x) + x) if fn is not None else (fn_out + x)

    # Trace-time guard: the fused fn must be shape- (and rank-) preserving.
    if fn is not None:
        probe = jax.eval_shape(fn, jax.ShapeDtypeStruct(x.shape, x.dtype))
        if probe.shape != x.shape:
            raise ValueError(
                "fused `fn` must be elementwise/shape-preserving; "
                "pass its precomputed output via fn_out instead")
        out_dtype = jnp.result_type(x.dtype, probe.dtype)
    else:
        out_dtype = jnp.result_type(x.dtype, fn_out.dtype)
    itemsize = jnp.dtype(out_dtype).itemsize

    n_operands = 2 if fn is not None else 3  # inputs + output
    target_block, budget = _chip_budget()
    per_block_cap = max(budget // (2 * n_operands), _LANE * _LANE * itemsize)
    target_block = min(target_block, per_block_cap)

    if total % _LANE == 0:
        # Common case: free bitcast-reshape into a lane-dense slab.
        cols, rows, block_rows = _lane_dense_layout(total, itemsize, target_block)
        slab_shape = (rows, cols)
        block_shape = (block_rows, cols)
        grid = (pl.cdiv(rows, block_rows),)
    else:
        # Rare ragged case: run on the original layout (trailing dims kept at
        # full extent, which the (8,128) rule always allows).  No wrapper-side
        # pad/slice copies; the only cost is masked stores on the last dim.
        # TODO(synk): if the trailing two dims alone exceed the VMEM block
        # budget, this path needs an in-kernel lane-masked tail instead.
        if x.ndim == 1:
            slab_shape = (1, total)
        else:
            lead = math.prod(orig_shape[:-2])
            slab_shape = (lead,) + tuple(orig_shape[-2:])
        tail_bytes = math.prod(slab_shape[1:]) * itemsize
        b_lead = max(min(target_block // max(tail_bytes, 1), slab_shape[0]), 1)
        block_shape = (b_lead,) + tuple(slab_shape[1:])
        grid = (pl.cdiv(slab_shape[0], b_lead),)

    nd = len(slab_shape)
    bspec = pl.BlockSpec(block_shape, lambda i: (i,) + (0,) * (nd - 1))

    def to_slab(a):
        return a.reshape(slab_shape)  # contiguous reshape: no HBM copy

    x_s = to_slab(x)

    if fn is not None:
        kernel = functools.partial(_residual_fused_kernel, fn=fn)
        inputs = (x_s,)
        in_specs = [bspec]
        io_alias = {0: 0} if (donate_x and x.dtype == out_dtype) else {}
    else:
        y_s = to_slab(fn_out)
        kernel = _residual_add_kernel
        inputs = (y_s, x_s)
        in_specs = [bspec, bspec]
        # Alias fn_out's slab to the output when possible (allocation win;
        # XLA inserts a defensive copy if the caller still uses fn_out).
        io_alias = {0: 0} if fn_out.dtype == out_dtype else {}

    n_bufs = (len(inputs) + 1) * 2  # double-buffered inputs + output
    block_bytes = math.prod(block_shape) * itemsize
    vmem_limit = int(max(n_bufs * block_bytes + (4 << 20), 16 << 20))

    out = pl.pallas_call(
        kernel,
        out_shape=jax.ShapeDtypeStruct(slab_shape, out_dtype),
        grid_spec=pltpu.PrefetchScalarGridSpec(
            num_scalar_prefetch=0,
            grid=grid,
            in_specs=in_specs,
            out_specs=bspec,
        ),
        compiler_params=pltpu.CompilerParams(
            dimension_semantics=("parallel",),  # megacore-shardable on v7x
            vmem_limit_bytes=vmem_limit,
        ),
        input_output_aliases=io_alias,
    )(*inputs)

    return out.reshape(orig_shape)


if __name__ == "__main__":
    key = jax.random.PRNGKey(0)
    # Small NCHW tensor consistent with a denoiser feature map.
    B, C, H, W = 2, 4, 16, 16
    x = jax.random.normal(key, (B, C, H, W), dtype=jnp.float32)

    # Residual around an elementwise fn (e.g. an activation block), fused in-kernel.
    # tanh-approx gelu keeps the transcendental on the EUP slot (free on v7x).
    fn = functools.partial(jax.nn.gelu, approximate=True)
    residual_fused = jax.jit(functools.partial(residual, fn=fn))
    out = jax.block_until_ready(residual_fused(x))
    ref = fn(x) + x
    assert out.shape == x.shape and out.dtype == x.dtype
    assert jnp.allclose(out, ref, atol=1e-5, rtol=1e-5), "mismatch vs reference (fused)"

    # Precomputed-fn_out path (non-elementwise submodule case).
    fn_out = jnp.tanh(x)  # stand-in for an arbitrary submodule's output
    residual_add = jax.jit(lambda x_, y_: residual(x_, fn_out=y_))
    out2 = jax.block_until_ready(residual_add(x, fn_out))
    assert jnp.allclose(out2, fn_out + x, atol=1e-5, rtol=1e-5), "mismatch (fn_out)"

    # Non-lane-aligned element count exercises the original-shape (ragged) path.
    x3 = jax.random.normal(key, (3, 5, 7), dtype=jnp.float32)
    out3 = jax.block_until_ready(residual_fused(x3))
    assert out3.shape == x3.shape
    assert jnp.allclose(out3, fn(x3) + x3, atol=1e-5, rtol=1e-5), "mismatch (ragged)"

    # Larger lane-dense tensor: exercises multi-block grid + divisor-rounded tiling.
    x4 = jax.random.normal(key, (2, 8, 64, 64), dtype=jnp.float32)
    out4 = jax.block_until_ready(residual_fused(x4))
    assert jnp.allclose(out4, fn(x4) + x4, atol=1e-5, rtol=1e-5), "mismatch (large)"

    print("KERNEL_OK")
</pallas_src>

<mosaic_0001>
module attributes {stable_mosaic.version = 11 : i64} {
  func.func @_residual_fused_kernel(%arg0: i32, %arg1: memref<1x2048xf32, #tpu.memory_space<vmem>>, %arg2: memref<1x2048xf32, #tpu.memory_space<vmem>>) attributes {dimension_semantics = [#tpu.dimension_semantics<parallel>], iteration_bounds = array<i64: 1>, scalar_prefetch = 0 : i64, scratch_operands = 0 : i64, tpu.core_type = #tpu.core_type<tc>, window_params = [{transform_indices = @transform_0, window_bounds = array<i64: 1, 2048>}, {transform_indices = @transform_1, window_bounds = array<i64: 1, 2048>}]} {
    %c0 = arith.constant 0 : index
    %c0_0 = arith.constant 0 : index
    %0 = vector.load %arg1[%c0, %c0_0] : memref<1x2048xf32, #tpu.memory_space<vmem>>, vector<1x2048xf32>
    %1 = arith.mulf %0, %0 : vector<1x2048xf32>
    %2 = arith.mulf %0, %1 : vector<1x2048xf32>
    %cst = arith.constant 4.471500e-02 : f32
    %3 = vector.broadcast %cst : f32 to vector<1x2048xf32>
    %4 = arith.mulf %3, %2 : vector<1x2048xf32>
    %5 = arith.addf %0, %4 : vector<1x2048xf32>
    %cst_1 = arith.constant 0.797884583 : f32
    %6 = vector.broadcast %cst_1 : f32 to vector<1x2048xf32>
    %7 = arith.mulf %6, %5 : vector<1x2048xf32>
    %8 = math.tanh %7 : vector<1x2048xf32>
    %cst_2 = arith.constant 1.000000e+00 : f32
    %9 = vector.broadcast %cst_2 : f32 to vector<1x2048xf32>
    %10 = arith.addf %9, %8 : vector<1x2048xf32>
    %cst_3 = arith.constant 5.000000e-01 : f32
    %11 = vector.broadcast %cst_3 : f32 to vector<1x2048xf32>
    %12 = arith.mulf %11, %10 : vector<1x2048xf32>
    %13 = arith.mulf %0, %12 : vector<1x2048xf32>
    %14 = arith.addf %13, %0 : vector<1x2048xf32>
    %c0_4 = arith.constant 0 : index
    %c0_5 = arith.constant 0 : index
    %15 = vector.load %arg2[%c0_4, %c0_5] : memref<1x2048xf32, #tpu.memory_space<vmem>>, vector<1x2048xf32>
    tpu.vector_store %arg2[%c0_4, %c0_5], %14 {strides = array<i32>} : memref<1x2048xf32, #tpu.memory_space<vmem>>, vector<1x2048xf32>,
    return
  }
  func.func @transform_0(%arg0: i32) -> (i32, i32) {
    %c0_i32 = arith.constant 0 : i32
    %c0_i32_0 = arith.constant 0 : i32
    return %arg0, %c0_i32 : i32, i32
  }
  func.func @transform_1(%arg0: i32) -> (i32, i32) {
    %c0_i32 = arith.constant 0 : i32
    %c0_i32_0 = arith.constant 0 : i32
    return %arg0, %c0_i32 : i32, i32
  }
}

</mosaic_0001>

<bundles_post_ra>
// kernel: residual.1
= control target key start
LH: loop header
LB: loop body
LE: loop exit
PB: predicated region body
PF: predicated region fallthrough
CT: control target
= control target key end

     0   :  { %s62_s0 = inlined_call_operand.vmem [shape: f32[1,2048], index: 0, kind: input, shape index: {}]   ;;  %s63_s1 = inlined_call_operand.vmem [shape: f32[1,2048], index: 1, kind: output, shape index: {}]  }
   0x1   :  { %v8_v0 = vld [vmem:[%s62_s0] sm:$0xff]  ;;  %v9_v1 = vld [vmem:[%s62_s0 + $0x8] sm:$0xff] }
   0x2   :  { %v10_v2 = vmul.f32 %v8_v0, %v8_v0  ;;  %v11_v3 = vmul.f32 %v9_v1, %v9_v1 }
   0x4   :  { %v12_v4 = vmul.f32 %v10_v2, %v8_v0  ;;  %v13_v5 = vmul.f32 %v11_v3, %v9_v1 }
   0x6   :  { %v14_v6 = vmul.f32 0.044715, %v12_v4  ;;  %v15_v7 = vmul.f32 0.044715, %v13_v5 }
   0x8   :  { %v16_v8 = vadd.f32 %v14_v6, %v8_v0  ;;  %v17_v9 = vadd.f32 %v15_v7, %v9_v1 }
   0xa   :  { %v18_v10 = vmul.f32 0.7978846, %v16_v8  ;;  %v19_v11 = vmul.f32 0.7978846, %v17_v9 }
   0xc   :  { %36 = vtanh.f32 %v18_v10 }
   0xd   :  { %38 = vtanh.f32 %v19_v11 }
  0x12   :  { %v37_v12 = vpop.eup %36 }
  0x13   :  { %v39_v13 = vpop.eup %38  ;;  %v22_v14 = vadd.f32 1.0, %v37_v12 }
  0x14   :  { %v23_v15 = vadd.f32 1.0, %v39_v13 }
  0x15   :  { %v24_v16 = vmul.f32 0.5, %v22_v14 }
  0x16   :  { %v25_v17 = vmul.f32 0.5, %v23_v15 }
  0x17   :  { %v26_v18 = vmul.f32 %v24_v16, %v8_v0 }
  0x18   :  { %v27_v19 = vmul.f32 %v25_v17, %v9_v1 }
  0x19   :  { %v28_v20 = vadd.f32 %v26_v18, %v8_v0 }
  0x1a   :  { %v29_v21 = vadd.f32 %v27_v19, %v9_v1 }
  0x1b   :  { %30 = vst [vmem:[%s63_s1] sm:$0xff] %v28_v20 }
  0x1c   :  { %31 = vst [vmem:[%s63_s1 + $0x8] sm:$0xff] %v29_v21 }

</bundles_post_ra>
